<compile_context>
chip_gen: v7x
topology: tpu7x:2x2x1
jax: 0.10.0
libtpu: 0.0.40
codegen_flags: <defaults>
</compile_context>

<pallas_src>
import jax
import jax.numpy as jnp
from jax.experimental import pallas as pl
from jax.experimental.pallas import tpu as pltpu


# ---------------------------------------------------------------------------
# helpers
# ---------------------------------------------------------------------------
def _largest_tile(total, target, align=1):
    """Largest divisor of `total` that is <= target and (multiple of `align`
    or equal to `total`)."""
    total = int(total)
    target = max(1, min(int(target), total))
    for t in range(target, 0, -1):
        if total % t == 0 and (t % align == 0 or t == total):
            return t
    return total


def _vmem_caps():
    """Per-generation (v5e/v6e: 128 MiB, v7x: 64 MiB) tile budget and limit."""
    cap = 64 * 1024 * 1024
    try:
        info = pltpu.get_tpu_info()
        cap = int(getattr(info, "vmem_capacity_bytes", cap)) or cap
    except Exception:
        pass
    budget = max(8 << 20, min(cap // 3, 44 << 20))       # per-tile working set
    limit = max(32 << 20, min((cap * 5) // 8, 96 << 20))  # scoped VMEM limit
    return budget, limit


# ---------------------------------------------------------------------------
# with_conv=True : pad(0,1,0,1) + Conv2d(C, C, kernel=3, stride=2)
# ---------------------------------------------------------------------------
def _conv_kernel(xm_ref, xh_ref, w01_ref, w2p_ref, b_ref, o_ref):
    # xm_ref : (1, TH, 2, Wsp, 2C) bf16  main band of super-rows (row pairs)
    # xh_ref : (1, 1,  2, Wsp, 2C) bf16  one-super-row halo (next band's row)
    # w01_ref: (3, 2C, Cout)       bf16  taps kx=0,1 stacked on K, per ky
    # w2p_ref: (3, 2C, Cout)       bf16  tap  kx=2, zero-padded to 2C, per ky
    # b_ref  : (1, Cout)           f32
    # o_ref  : (1, TH, Wo, Cout)   input dtype
    TH, Wo, Cout = o_ref.shape[1], o_ref.shape[2], o_ref.shape[3]
    Wsp, C2 = xm_ref.shape[3], xm_ref.shape[4]

    xm = xm_ref[0]                            # (TH, 2, Wsp, 2C)
    a0 = xm[:, 0].reshape(TH * Wsp, C2)       # py=0 rows (free fold: Wsp%16==0)
    a1 = xm[:, 1].reshape(TH * Wsp, C2)       # py=1 rows
    h0 = xh_ref[0, 0, 0]                      # (Wsp, 2C) halo row, py=0

    def mm(a, w):
        return jnp.dot(a, w, preferred_element_type=jnp.float32)

    # Full-width matmuls: aligned (kx=0,1) vs shifted-by-one-super-col (kx=2).
    ta = (mm(a0, w01_ref[0]) + mm(a1, w01_ref[1])).reshape(TH, Wsp, Cout)
    ts = (mm(a0, w2p_ref[0]) + mm(a1, w2p_ref[1])).reshape(TH, Wsp, Cout)
    ha = mm(h0, w01_ref[2])                   # (Wsp, Cout) ky=2 from halo row
    hb = mm(h0, w2p_ref[2])
    bias = b_ref[...]                         # (1, Cout)

    if TH > 1:
        # ky=2 for output rows [0, TH-1): phase-0 slab shifted down one row.
        da = mm(a0, w01_ref[2]).reshape(TH, Wsp, Cout)
        ds = mm(a0, w2p_ref[2]).reshape(TH, Wsp, Cout)
        al = ta[:TH - 1] + da[1:]             # outer-axis row shift: free
        sh = ts[:TH - 1] + ds[1:]
        top = al[:, :Wo] + sh[:, 1:Wo + 1] + bias
        o_ref[0, :TH - 1] = top.astype(o_ref.dtype)

    al_l = ta[TH - 1] + ha                    # (Wsp, Cout)
    sh_l = ts[TH - 1] + hb
    last = al_l[:Wo] + sh_l[1:Wo + 1] + bias
    o_ref[0, TH - 1] = last.astype(o_ref.dtype)


def downsample_conv_nhwc(x_nhwc, weight, bias, max_row_tile=None, out_dtype=None):
    """Core conv path, NHWC in / NHWC out (no boundary transposes).
    x_nhwc: (N, H, W, C); weight: (Cout, C, 3, 3); bias: (Cout,)."""
    N, H, W, Cin = x_nhwc.shape
    Cout = weight.shape[0]
    Ho, Wo = H // 2, W // 2
    Hs, Ws = Ho + 1, Wo + 1
    Wsp = ((Ws + 15) // 16) * 16      # dense bf16 (16,128) tiles -> free folds
    out_dtype = x_nhwc.dtype if out_dtype is None else out_dtype

    # Zero-pad bottom/right (includes the module's (0,1,0,1) pad), then a
    # *free* contiguous reshape into the phase-split layout:
    #   xs[n, hs, py, ws, px*C + c] == xpad[n, 2*hs + py, 2*ws + px, c]
    x = jnp.pad(x_nhwc.astype(jnp.bfloat16),
                ((0, 0), (0, 2 * Hs - H), (0, 2 * Wsp - W), (0, 0)))
    xs = x.reshape(N, Hs, 2, Wsp, 2 * Cin)

    # (Cout, Cin, ky, kx) -> per-ky (2C, Cout) matrices matching the lane pack.
    wt = jnp.transpose(weight, (2, 3, 1, 0)).astype(jnp.bfloat16)  # (3,3,Cin,Cout)
    w01 = jnp.concatenate([wt[:, 0], wt[:, 1]], axis=1)            # (3, 2Cin, Cout)
    w2p = jnp.concatenate([wt[:, 2], jnp.zeros_like(wt[:, 2])], axis=1)
    b2 = bias.reshape(1, Cout).astype(jnp.float32)

    out_b = jnp.dtype(out_dtype).itemsize
    budget, vmem_limit = _vmem_caps()
    # Per-output-row working set: input band dbuf + live values + f32 partials
    # + output dbuf.
    bytes_per_row = 24 * Wsp * Cin + 28 * Wsp * Cout + 2 * Wo * Cout * out_b
    th_cap = max(1, budget // max(1, bytes_per_row))
    if N == 1 and Ho >= 2:
        th_cap = min(th_cap, max(1, Ho // 2))   # >=2 parallel tiles for 2-TC chips
    if max_row_tile is not None:
        th_cap = min(th_cap, max_row_tile)
    TH = _largest_tile(Ho, th_cap)
    nH = Ho // TH

    # TODO(synk): pad Cout to a multiple of 128 when it is large but unaligned;
    # typical encoder channel counts (128/256/512) are already lane-aligned.

    out = pl.pallas_call(
        _conv_kernel,
        out_shape=jax.ShapeDtypeStruct((N, Ho, Wo, Cout), out_dtype),
        grid_spec=pltpu.PrefetchScalarGridSpec(
            num_scalar_prefetch=0,
            grid=(N, nH),
            in_specs=[
                pl.BlockSpec((1, TH, 2, Wsp, 2 * Cin),
                             lambda n, h: (n, h, 0, 0, 0)),
                pl.BlockSpec((1, 1, 2, Wsp, 2 * Cin),
                             lambda n, h: (n, (h + 1) * TH, 0, 0, 0)),
                pl.BlockSpec((3, 2 * Cin, Cout), lambda n, h: (0, 0, 0)),
                pl.BlockSpec((3, 2 * Cin, Cout), lambda n, h: (0, 0, 0)),
                pl.BlockSpec((1, Cout), lambda n, h: (0, 0)),
            ],
            out_specs=pl.BlockSpec((1, TH, Wo, Cout), lambda n, h: (n, h, 0, 0)),
        ),
        compiler_params=pltpu.CompilerParams(
            dimension_semantics=("parallel", "parallel"),
            vmem_limit_bytes=vmem_limit),
    )(xs, xs, w01, w2p, b2)
    return out


def downsample_conv(x_nchw, weight, bias, max_row_tile=None):
    """NCHW module boundary (PyTorch contract).  The boundary transposes are
    plain XLA passes; use downsample_conv_nhwc directly to avoid them."""
    x_nhwc = jnp.transpose(x_nchw.astype(jnp.bfloat16), (0, 2, 3, 1))
    out = downsample_conv_nhwc(x_nhwc, weight, bias,
                               max_row_tile=max_row_tile,
                               out_dtype=x_nchw.dtype)
    return jnp.transpose(out, (0, 3, 1, 2))


# ---------------------------------------------------------------------------
# with_conv=False : avg_pool2d(kernel=2, stride=2), NCHW-native (no transposes)
# ---------------------------------------------------------------------------
def _avgpool_kernel(x_ref, p_ref, o_ref):
    # x_ref: (TB, 2*W)  input dtype -- lane-dense H-phase pair per (n,c,ho) row
    # p_ref: (CW, CWo)  bf16        -- 0/1 column-pair selection (one chunk)
    # o_ref: (TB, Wo)   input dtype
    W = x_ref.shape[1] // 2
    Wo = o_ref.shape[1]
    CW, CWo = p_ref.shape

    s = (x_ref[:, :W].astype(jnp.float32)
         + x_ref[:, W:].astype(jnp.float32)) * 0.25          # exact f32
    # Exact 3-way bf16 split so the MXU pair-sum matches f32 arithmetic.
    h1 = s.astype(jnp.bfloat16)
    r1 = s - h1.astype(jnp.float32)
    h2 = r1.astype(jnp.bfloat16)
    h3 = (r1 - h2.astype(jnp.float32)).astype(jnp.bfloat16)
    p_full = p_ref[...]

    nc = (Wo + CWo - 1) // CWo
    for j in range(nc):                       # static; block-diagonal selection
        wo0 = j * CWo
        cwo = min(CWo, Wo - wo0)
        w0, cw = 2 * wo0, 2 * cwo
        p = p_full[:cw, :cwo]
        acc = jnp.dot(h1[:, w0:w0 + cw], p, preferred_element_type=jnp.float32)
        acc = acc + jnp.dot(h2[:, w0:w0 + cw], p, preferred_element_type=jnp.float32)
        acc = acc + jnp.dot(h3[:, w0:w0 + cw], p, preferred_element_type=jnp.float32)
        o_ref[:, wo0:wo0 + cwo] = acc.astype(o_ref.dtype)


def downsample_avgpool(x_nchw):
    """with_conv=False path: avg_pool2d(kernel=2, stride=2), stays in NCHW."""
    N, C, H, W = x_nchw.shape
    Ho, Wo = H // 2, W // 2
    x = x_nchw if H == 2 * Ho else x_nchw[:, :, :2 * Ho, :]
    # Free contiguous reshape: fuse (N, C, out-row) and expose the H-phase pair
    # on the lane axis (first W lanes = even row, last W lanes = odd row).
    xr = x.reshape(N * C * Ho, 2 * W)
    M = N * C * Ho

    CWo = min(Wo, 128)
    CW = 2 * CWo
    # 0/1 matrix summing adjacent column pairs within one 256-lane chunk.
    pool = (jnp.arange(CW)[:, None] // 2
            == jnp.arange(CWo)[None, :]).astype(jnp.bfloat16)

    in_b = jnp.dtype(x_nchw.dtype).itemsize
    budget, vmem_limit = _vmem_caps()
    bytes_per_m = 2 * (2 * W * in_b) + 2 * (Wo * in_b) + (12 + 2 * in_b) * W
    target = max(8, min(budget // max(1, bytes_per_m), 4096))
    if M >= 16:
        target = min(target, max(8, M // 2))   # >=2 grid steps for 2-TC chips

    Mg = M
    if M % 8 != 0 and M > 8:
        Mg = ((M + 7) // 8) * 8                # rare: keep sublane tiles dense
        xr = jnp.pad(xr, ((0, Mg - M), (0, 0)))
    TB = _largest_tile(Mg, min(target, Mg), align=8)

    out = pl.pallas_call(
        _avgpool_kernel,
        out_shape=jax.ShapeDtypeStruct((Mg, Wo), x_nchw.dtype),
        grid_spec=pltpu.PrefetchScalarGridSpec(
            num_scalar_prefetch=0,
            grid=(Mg // TB,),
            in_specs=[
                pl.BlockSpec((TB, 2 * W), lambda m: (m, 0)),
                pl.BlockSpec((CW, CWo), lambda m: (0, 0)),
            ],
            out_specs=pl.BlockSpec((TB, Wo), lambda m: (m, 0)),
        ),
        compiler_params=pltpu.CompilerParams(
            dimension_semantics=("parallel",),
            vmem_limit_bytes=vmem_limit),
    )(xr, pool)

    if Mg != M:
        out = out[:M]
    return out.reshape(N, C, Ho, Wo)


def downsample(x_nchw, with_conv, weight=None, bias=None):
    if with_conv:
        return downsample_conv(x_nchw, weight, bias)
    return downsample_avgpool(x_nchw)


# ---------------------------------------------------------------------------
# Pure-JAX references for validation
# ---------------------------------------------------------------------------
def _ref_conv(x_nchw, weight, bias):
    xp = jnp.pad(x_nchw, ((0, 0), (0, 0), (0, 1), (0, 1)))
    out = jax.lax.conv_general_dilated(
        xp, weight, window_strides=(2, 2), padding="VALID",
        dimension_numbers=("NCHW", "OIHW", "NCHW"),
        precision=jax.lax.Precision.HIGHEST)
    return out + bias.reshape(1, -1, 1, 1)


def _ref_avgpool(x_nchw):
    N, C, H, W = x_nchw.shape
    Ho, Wo = H // 2, W // 2
    return x_nchw[:, :, :2 * Ho, :2 * Wo].reshape(
        N, C, Ho, 2, Wo, 2).mean(axis=(3, 5))


# ---------------------------------------------------------------------------
if __name__ == "__main__":
    key = jax.random.PRNGKey(0)
    k_x, k_w, k_b, k_x2, k_w2, k_b2, k_x3 = jax.random.split(key, 7)

    N, C, H, W = 2, 4, 16, 16
    x = jax.random.normal(k_x, (N, C, H, W), dtype=jnp.float32)
    fan_in = C * 9
    bound = 1.0 / (fan_in ** 0.5)
    weight = jax.random.uniform(k_w, (C, C, 3, 3), jnp.float32, -bound, bound)
    bias = jax.random.uniform(k_b, (C,), jnp.float32, -bound, bound)

    # ---- with_conv = True --------------------------------------------------
    y_conv = jax.block_until_ready(downsample(x, True, weight, bias))
    assert y_conv.shape == (N, C, H // 2, W // 2), y_conv.shape
    # The kernel feeds bf16 activations/weights to the MXU (f32 accumulation),
    # so the tight check uses the same quantization on the reference inputs.
    xq = x.astype(jnp.bfloat16).astype(jnp.float32)
    wq = weight.astype(jnp.bfloat16).astype(jnp.float32)
    ref_cq = _ref_conv(xq, wq, bias)
    assert jnp.allclose(y_conv, ref_cq, atol=1e-4, rtol=1e-4), \
        float(jnp.max(jnp.abs(y_conv - ref_cq)))
    # Loose sanity check against the full-f32 PyTorch-equivalent conv.
    ref_cf = _ref_conv(x, weight, bias)
    assert jnp.allclose(y_conv, ref_cf, atol=5e-2, rtol=5e-2)

    # ---- with_conv = True, multi-row-tile path (exercises the halo) --------
    N2, C2, H2, W2 = 1, 8, 32, 32
    x2 = jax.random.normal(k_x2, (N2, C2, H2, W2), dtype=jnp.float32)
    bound2 = 1.0 / ((C2 * 9) ** 0.5)
    weight2 = jax.random.uniform(k_w2, (C2, C2, 3, 3), jnp.float32, -bound2, bound2)
    bias2 = jax.random.uniform(k_b2, (C2,), jnp.float32, -bound2, bound2)
    y_conv2 = jax.block_until_ready(
        downsample_conv(x2, weight2, bias2, max_row_tile=4))  # forces 4 row tiles
    ref2 = _ref_conv(x2.astype(jnp.bfloat16).astype(jnp.float32),
                     weight2.astype(jnp.bfloat16).astype(jnp.float32), bias2)
    assert y_conv2.shape == (N2, C2, H2 // 2, W2 // 2)
    assert jnp.allclose(y_conv2, ref2, atol=1e-4, rtol=1e-4), \
        float(jnp.max(jnp.abs(y_conv2 - ref2)))

    # ---- with_conv = False -------------------------------------------------
    y_pool = jax.block_until_ready(downsample(x, False))
    ref_p = _ref_avgpool(x)
    assert y_pool.shape == (N, C, H // 2, W // 2), y_pool.shape
    assert jnp.allclose(y_pool, ref_p, atol=1e-5, rtol=1e-5), \
        float(jnp.max(jnp.abs(y_pool - ref_p)))

    # ---- with_conv = False, odd sizes / unaligned row count ----------------
    x3 = jax.random.normal(k_x3, (1, 3, 6, 10), dtype=jnp.float32)
    y_pool3 = jax.block_until_ready(downsample(x3, False))
    ref_p3 = _ref_avgpool(x3)
    assert y_pool3.shape == (1, 3, 3, 5), y_pool3.shape
    assert jnp.allclose(y_pool3, ref_p3, atol=1e-5, rtol=1e-5), \
        float(jnp.max(jnp.abs(y_pool3 - ref_p3)))

    print("KERNEL_OK")
</pallas_src>

<mosaic_0001>
module attributes {stable_mosaic.version = 11 : i64} {
  func.func @_conv_kernel(%arg0: i32, %arg1: i32, %arg2: memref<1x8x2x16x8xbf16, #tpu.memory_space<vmem>>, %arg3: memref<1x1x2x16x8xbf16, #tpu.memory_space<vmem>>, %arg4: memref<3x8x4xbf16, #tpu.memory_space<vmem>>, %arg5: memref<3x8x4xbf16, #tpu.memory_space<vmem>>, %arg6: memref<1x4xf32, #tpu.memory_space<vmem>>, %arg7: memref<1x8x8x4xf32, #tpu.memory_space<vmem>>) attributes {dimension_semantics = [#tpu.dimension_semantics<parallel>, #tpu.dimension_semantics<parallel>], iteration_bounds = array<i64: 2, 1>, scalar_prefetch = 0 : i64, scratch_operands = 0 : i64, tpu.core_type = #tpu.core_type<tc>, window_params = [{transform_indices = @transform_0, window_bounds = array<i64: 1, 8, 2, 16, 8>}, {transform_indices = @transform_1, window_bounds = array<i64: 1, 1, 2, 16, 8>}, {pipeline_mode = #tpu.pipeline_mode<synchronous>, transform_indices = @transform_2, window_bounds = array<i64: 3, 8, 4>}, {pipeline_mode = #tpu.pipeline_mode<synchronous>, transform_indices = @transform_3, window_bounds = array<i64: 3, 8, 4>}, {pipeline_mode = #tpu.pipeline_mode<synchronous>, transform_indices = @transform_4, window_bounds = array<i64: 1, 4>}, {transform_indices = @transform_5, window_bounds = array<i64: 1, 8, 8, 4>}]} {
    %c0 = arith.constant 0 : index
    %c0_0 = arith.constant 0 : index
    %c0_1 = arith.constant 0 : index
    %c0_2 = arith.constant 0 : index
    %c0_3 = arith.constant 0 : index
    %0 = vector.load %arg2[%c0, %c0_0, %c0_1, %c0_2, %c0_3] : memref<1x8x2x16x8xbf16, #tpu.memory_space<vmem>>, vector<1x8x2x16x8xbf16>
    %1 = vector.shape_cast %0 : vector<1x8x2x16x8xbf16> to vector<8x2x16x8xbf16>
    %2 = vector.extract_strided_slice %1 {offsets = [0, 0, 0, 0], sizes = [8, 1, 16, 8], strides = [1, 1, 1, 1]} : vector<8x2x16x8xbf16> to vector<8x1x16x8xbf16>
    %3 = vector.shape_cast %2 : vector<8x1x16x8xbf16> to vector<8x16x8xbf16>
    %4 = vector.shape_cast %3 : vector<8x16x8xbf16> to vector<128x8xbf16>
    %5 = vector.extract_strided_slice %1 {offsets = [0, 1, 0, 0], sizes = [8, 1, 16, 8], strides = [1, 1, 1, 1]} : vector<8x2x16x8xbf16> to vector<8x1x16x8xbf16>
    %6 = vector.shape_cast %5 : vector<8x1x16x8xbf16> to vector<8x16x8xbf16>
    %7 = vector.shape_cast %6 : vector<8x16x8xbf16> to vector<128x8xbf16>
    %c0_4 = arith.constant 0 : index
    %c0_5 = arith.constant 0 : index
    %c0_6 = arith.constant 0 : index
    %c0_7 = arith.constant 0 : index
    %c0_8 = arith.constant 0 : index
    %8 = vector.load %arg3[%c0_4, %c0_5, %c0_6, %c0_7, %c0_8] : memref<1x1x2x16x8xbf16, #tpu.memory_space<vmem>>, vector<1x1x1x16x8xbf16>
    %9 = vector.shape_cast %8 : vector<1x1x1x16x8xbf16> to vector<16x8xbf16>
    %c0_9 = arith.constant 0 : index
    %c0_10 = arith.constant 0 : index
    %c0_11 = arith.constant 0 : index
    %10 = vector.load %arg4[%c0_9, %c0_10, %c0_11] : memref<3x8x4xbf16, #tpu.memory_space<vmem>>, vector<1x8x4xbf16>
    %11 = vector.shape_cast %10 : vector<1x8x4xbf16> to vector<8x4xbf16>
    %cst = arith.constant dense<0.000000e+00> : vector<128x4xf32>
    %12 = tpu.matmul %4, %11, %cst {dimension_numbers = #tpu.dot_dimension_numbers<[1], [0], [0], [1], [0, 0, 1, 1], [], []>} : vector<128x8xbf16>, vector<8x4xbf16>, vector<128x4xf32> -> vector<128x4xf32>
    %c1 = arith.constant 1 : index
    %c0_12 = arith.constant 0 : index
    %c0_13 = arith.constant 0 : index
    %13 = vector.load %arg4[%c1, %c0_12, %c0_13] : memref<3x8x4xbf16, #tpu.memory_space<vmem>>, vector<1x8x4xbf16>
    %14 = vector.shape_cast %13 : vector<1x8x4xbf16> to vector<8x4xbf16>
    %cst_14 = arith.constant dense<0.000000e+00> : vector<128x4xf32>
    %15 = tpu.matmul %7, %14, %cst_14 {dimension_numbers = #tpu.dot_dimension_numbers<[1], [0], [0], [1], [0, 0, 1, 1], [], []>} : vector<128x8xbf16>, vector<8x4xbf16>, vector<128x4xf32> -> vector<128x4xf32>
    %16 = arith.addf %12, %15 : vector<128x4xf32>
    %17 = vector.shape_cast %16 : vector<128x4xf32> to vector<8x16x4xf32>
    %c0_15 = arith.constant 0 : index
    %c0_16 = arith.constant 0 : index
    %c0_17 = arith.constant 0 : index
    %18 = vector.load %arg5[%c0_15, %c0_16, %c0_17] : memref<3x8x4xbf16, #tpu.memory_space<vmem>>, vector<1x8x4xbf16>
    %19 = vector.shape_cast %18 : vector<1x8x4xbf16> to vector<8x4xbf16>
    %cst_18 = arith.constant dense<0.000000e+00> : vector<128x4xf32>
    %20 = tpu.matmul %4, %19, %cst_18 {dimension_numbers = #tpu.dot_dimension_numbers<[1], [0], [0], [1], [0, 0, 1, 1], [], []>} : vector<128x8xbf16>, vector<8x4xbf16>, vector<128x4xf32> -> vector<128x4xf32>
    %c1_19 = arith.constant 1 : index
    %c0_20 = arith.constant 0 : index
    %c0_21 = arith.constant 0 : index
    %21 = vector.load %arg5[%c1_19, %c0_20, %c0_21] : memref<3x8x4xbf16, #tpu.memory_space<vmem>>, vector<1x8x4xbf16>
    %22 = vector.shape_cast %21 : vector<1x8x4xbf16> to vector<8x4xbf16>
    %cst_22 = arith.constant dense<0.000000e+00> : vector<128x4xf32>
    %23 = tpu.matmul %7, %22, %cst_22 {dimension_numbers = #tpu.dot_dimension_numbers<[1], [0], [0], [1], [0, 0, 1, 1], [], []>} : vector<128x8xbf16>, vector<8x4xbf16>, vector<128x4xf32> -> vector<128x4xf32>
    %24 = arith.addf %20, %23 : vector<128x4xf32>
    %25 = vector.shape_cast %24 : vector<128x4xf32> to vector<8x16x4xf32>
    %c2 = arith.constant 2 : index
    %c0_23 = arith.constant 0 : index
    %c0_24 = arith.constant 0 : index
    %26 = vector.load %arg4[%c2, %c0_23, %c0_24] : memref<3x8x4xbf16, #tpu.memory_space<vmem>>, vector<1x8x4xbf16>
    %27 = vector.shape_cast %26 : vector<1x8x4xbf16> to vector<8x4xbf16>
    %cst_25 = arith.constant dense<0.000000e+00> : vector<16x4xf32>
    %28 = tpu.matmul %9, %27, %cst_25 {dimension_numbers = #tpu.dot_dimension_numbers<[1], [0], [0], [1], [0, 0, 1, 1], [], []>} : vector<16x8xbf16>, vector<8x4xbf16>, vector<16x4xf32> -> vector<16x4xf32>
    %c2_26 = arith.constant 2 : index
    %c0_27 = arith.constant 0 : index
    %c0_28 = arith.constant 0 : index
    %29 = vector.load %arg5[%c2_26, %c0_27, %c0_28] : memref<3x8x4xbf16, #tpu.memory_space<vmem>>, vector<1x8x4xbf16>
    %30 = vector.shape_cast %29 : vector<1x8x4xbf16> to vector<8x4xbf16>
    %cst_29 = arith.constant dense<0.000000e+00> : vector<16x4xf32>
    %31 = tpu.matmul %9, %30, %cst_29 {dimension_numbers = #tpu.dot_dimension_numbers<[1], [0], [0], [1], [0, 0, 1, 1], [], []>} : vector<16x8xbf16>, vector<8x4xbf16>, vector<16x4xf32> -> vector<16x4xf32>
    %c0_30 = arith.constant 0 : index
    %c0_31 = arith.constant 0 : index
    %32 = vector.load %arg6[%c0_30, %c0_31] : memref<1x4xf32, #tpu.memory_space<vmem>>, vector<1x4xf32>
    %c2_32 = arith.constant 2 : index
    %c0_33 = arith.constant 0 : index
    %c0_34 = arith.constant 0 : index
    %33 = vector.load %arg4[%c2_32, %c0_33, %c0_34] : memref<3x8x4xbf16, #tpu.memory_space<vmem>>, vector<1x8x4xbf16>
    %34 = vector.shape_cast %33 : vector<1x8x4xbf16> to vector<8x4xbf16>
    %cst_35 = arith.constant dense<0.000000e+00> : vector<128x4xf32>
    %35 = tpu.matmul %4, %34, %cst_35 {dimension_numbers = #tpu.dot_dimension_numbers<[1], [0], [0], [1], [0, 0, 1, 1], [], []>} : vector<128x8xbf16>, vector<8x4xbf16>, vector<128x4xf32> -> vector<128x4xf32>
    %36 = vector.shape_cast %35 : vector<128x4xf32> to vector<8x16x4xf32>
    %c2_36 = arith.constant 2 : index
    %c0_37 = arith.constant 0 : index
    %c0_38 = arith.constant 0 : index
    %37 = vector.load %arg5[%c2_36, %c0_37, %c0_38] : memref<3x8x4xbf16, #tpu.memory_space<vmem>>, vector<1x8x4xbf16>
    %38 = vector.shape_cast %37 : vector<1x8x4xbf16> to vector<8x4xbf16>
    %cst_39 = arith.constant dense<0.000000e+00> : vector<128x4xf32>
    %39 = tpu.matmul %4, %38, %cst_39 {dimension_numbers = #tpu.dot_dimension_numbers<[1], [0], [0], [1], [0, 0, 1, 1], [], []>} : vector<128x8xbf16>, vector<8x4xbf16>, vector<128x4xf32> -> vector<128x4xf32>
    %40 = vector.shape_cast %39 : vector<128x4xf32> to vector<8x16x4xf32>
    %41 = vector.extract_strided_slice %17 {offsets = [0, 0, 0], sizes = [7, 16, 4], strides = [1, 1, 1]} : vector<8x16x4xf32> to vector<7x16x4xf32>
    %42 = vector.extract_strided_slice %36 {offsets = [1, 0, 0], sizes = [7, 16, 4], strides = [1, 1, 1]} : vector<8x16x4xf32> to vector<7x16x4xf32>
    %43 = arith.addf %41, %42 : vector<7x16x4xf32>
    %44 = vector.extract_strided_slice %25 {offsets = [0, 0, 0], sizes = [7, 16, 4], strides = [1, 1, 1]} : vector<8x16x4xf32> to vector<7x16x4xf32>
    %45 = vector.extract_strided_slice %40 {offsets = [1, 0, 0], sizes = [7, 16, 4], strides = [1, 1, 1]} : vector<8x16x4xf32> to vector<7x16x4xf32>
    %46 = arith.addf %44, %45 : vector<7x16x4xf32>
    %47 = vector.extract_strided_slice %43 {offsets = [0, 0, 0], sizes = [7, 8, 4], strides = [1, 1, 1]} : vector<7x16x4xf32> to vector<7x8x4xf32>
    %48 = vector.extract_strided_slice %46 {offsets = [0, 1, 0], sizes = [7, 8, 4], strides = [1, 1, 1]} : vector<7x16x4xf32> to vector<7x8x4xf32>
    %49 = arith.addf %47, %48 : vector<7x8x4xf32>
    %50 = vector.shape_cast %32 : vector<1x4xf32> to vector<1x1x4xf32>
    %51 = vector.broadcast %50 : vector<1x1x4xf32> to vector<7x8x4xf32>
    %52 = arith.addf %49, %51 : vector<7x8x4xf32>
    %c0_40 = arith.constant 0 : index
    %c0_41 = arith.constant 0 : index
    %c0_42 = arith.constant 0 : index
    %c0_43 = arith.constant 0 : index
    %53 = vector.load %arg7[%c0_40, %c0_41, %c0_42, %c0_43] : memref<1x8x8x4xf32, #tpu.memory_space<vmem>>, vector<1x7x8x4xf32>
    %54 = vector.shape_cast %53 : vector<1x7x8x4xf32> to vector<7x8x4xf32>
    %55 = vector.shape_cast %52 : vector<7x8x4xf32> to vector<1x7x8x4xf32>
    tpu.vector_store %arg7[%c0_40, %c0_41, %c0_42, %c0_43], %55 {strides = array<i32>} : memref<1x8x8x4xf32, #tpu.memory_space<vmem>>, vector<1x7x8x4xf32>,
    %56 = vector.extract_strided_slice %17 {offsets = [7, 0, 0], sizes = [1, 16, 4], strides = [1, 1, 1]} : vector<8x16x4xf32> to vector<1x16x4xf32>
    %57 = vector.shape_cast %56 : vector<1x16x4xf32> to vector<16x4xf32>
    %58 = arith.addf %57, %28 : vector<16x4xf32>
    %59 = vector.extract_strided_slice %25 {offsets = [7, 0, 0], sizes = [1, 16, 4], strides = [1, 1, 1]} : vector<8x16x4xf32> to vector<1x16x4xf32>
    %60 = vector.shape_cast %59 : vector<1x16x4xf32> to vector<16x4xf32>
    %61 = arith.addf %60, %31 : vector<16x4xf32>
    %62 = vector.extract_strided_slice %58 {offsets = [0, 0], sizes = [8, 4], strides = [1, 1]} : vector<16x4xf32> to vector<8x4xf32>
    %63 = vector.extract_strided_slice %61 {offsets = [1, 0], sizes = [8, 4], strides = [1, 1]} : vector<16x4xf32> to vector<8x4xf32>
    %64 = arith.addf %62, %63 : vector<8x4xf32>
    %65 = vector.broadcast %32 : vector<1x4xf32> to vector<8x4xf32>
    %66 = arith.addf %64, %65 : vector<8x4xf32>
    %c0_44 = arith.constant 0 : index
    %c7 = arith.constant 7 : index
    %c0_45 = arith.constant 0 : index
    %c0_46 = arith.constant 0 : index
    %67 = vector.load %arg7[%c0_44, %c7, %c0_45, %c0_46] : memref<1x8x8x4xf32, #tpu.memory_space<vmem>>, vector<1x1x8x4xf32>
    %68 = vector.shape_cast %67 : vector<1x1x8x4xf32> to vector<8x4xf32>
    %69 = vector.shape_cast %66 : vector<8x4xf32> to vector<1x1x8x4xf32>
    tpu.vector_store %arg7[%c0_44, %c7, %c0_45, %c0_46], %69 {strides = array<i32>} : memref<1x8x8x4xf32, #tpu.memory_space<vmem>>, vector<1x1x8x4xf32>,
    return
  }
  func.func @transform_0(%arg0: i32, %arg1: i32) -> (i32, i32, i32, i32, i32) {
    %c0_i32 = arith.constant 0 : i32
    %c0_i32_0 = arith.constant 0 : i32
    %c0_i32_1 = arith.constant 0 : i32
    %c0_i32_2 = arith.constant 0 : i32
    return %arg0, %arg1, %c0_i32, %c0_i32_0, %c0_i32_1 : i32, i32, i32, i32, i32
  }
  func.func @transform_1(%arg0: i32, %arg1: i32) -> (i32, i32, i32, i32, i32) {
    %c1_i32 = arith.constant 1 : i32
    %0 = arith.addi %arg1, %c1_i32 : i32
    %c8_i32 = arith.constant 8 : i32
    %1 = arith.muli %0, %c8_i32 : i32
    %c0_i32 = arith.constant 0 : i32
    %c0_i32_0 = arith.constant 0 : i32
    %c0_i32_1 = arith.constant 0 : i32
    %c0_i32_2 = arith.constant 0 : i32
    return %arg0, %1, %c0_i32, %c0_i32_0, %c0_i32_1 : i32, i32, i32, i32, i32
  }
  func.func @transform_2(%arg0: i32, %arg1: i32) -> (i32, i32, i32) {
    %c0_i32 = arith.constant 0 : i32
    %c0_i32_0 = arith.constant 0 : i32
    %c0_i32_1 = arith.constant 0 : i32
    %c0_i32_2 = arith.constant 0 : i32
    return %c0_i32, %c0_i32_0, %c0_i32_1 : i32, i32, i32
  }
  func.func @transform_3(%arg0: i32, %arg1: i32) -> (i32, i32, i32) {
    %c0_i32 = arith.constant 0 : i32
    %c0_i32_0 = arith.constant 0 : i32
    %c0_i32_1 = arith.constant 0 : i32
    %c0_i32_2 = arith.constant 0 : i32
    return %c0_i32, %c0_i32_0, %c0_i32_1 : i32, i32, i32
  }
  func.func @transform_4(%arg0: i32, %arg1: i32) -> (i32, i32) {
    %c0_i32 = arith.constant 0 : i32
    %c0_i32_0 = arith.constant 0 : i32
    %c0_i32_1 = arith.constant 0 : i32
    return %c0_i32, %c0_i32_0 : i32, i32
  }
  func.func @transform_5(%arg0: i32, %arg1: i32) -> (i32, i32, i32, i32) {
    %c0_i32 = arith.constant 0 : i32
    %c0_i32_0 = arith.constant 0 : i32
    %c0_i32_1 = arith.constant 0 : i32
    return %arg0, %arg1, %c0_i32, %c0_i32_0 : i32, i32, i32, i32
  }
}

</mosaic_0001>

<bundles_post_ra>
// kernel: tpu_custom_call.1
= control target key start
LH: loop header
LB: loop body
LE: loop exit
PB: predicated region body
PF: predicated region fallthrough
CT: control target
= control target key end

     0   :  { %s1800_s18 = smov 0   ;;  %s1802_s19 = smov 0   ;;  %s2039_s0 = inlined_call_operand.vmem [shape: bf16[2,9,2,16,8], index: 0, kind: input, shape index: {}]   ;;  %s2040_s1 = inlined_call_operand.vmem [shape: bf16[2,9,2,16,8], index: 1, kind: input, shape index: {}]   ;;  %s2041_s2 = inlined_call_operand.vmem [shape: bf16[3,8,4], index: 2, kind: input, shape index: {}]   ;;  %s2042_s3 = inlined_call_operand.vmem [shape: bf16[3,8,4], index: 3, kind: input, shape index: {}]   ;;  %s2043_s4 = inlined_call_operand.vmem [shape: f32[1,4], index: 4, kind: input, shape index: {}]   ;;  %s2044_s5 = inlined_call_operand.vmem [shape: f32[2,8,8,4], index: 5, kind: output, shape index: {}]  }
   0x1   :  { %s1804_s20 = smov 0  }
   0x2 LB: > { %s27_s21 = sadd.s32 1, %s1762_s19  ;;  %p1403_p0 = scmp.ge.s32.totalorder %s1766_s20, 1  ;;  %s1766_s20 = sphi %s1804_s20, %s15_s20   ;;  %s1762_s19 = sphi %s1802_s19, %s2046_s19   ;;  %s1758_s18 = sphi %s1800_s18, %s2045_s18  }
   0x3   : > { %p29_p1 = scmp.ge.s32.totalorder %s27_s21, 2  ;;  %p245_p2 = scmp.lt.s32.totalorder %s1766_s20, 3 }
   0x5   : > { %s2048_s21 = smov (%p29_p1, %s27_s21), 0  ;;  %p246_p3 = pnand %p1403_p0, %p245_p2 }
   0x6   : > { %vm448_vm0 = vcmask (!%p246_p3), 1043456   ;;  %v1441_v0 = vld [vmem:[%s2042_s3 + $0x4] sm:$0xf] (!%p246_p3)  ;;  %p306_p4 = scmp.lt.s32.totalorder (!%p246_p3), %s1758_s18, 1  ;;  %v697_v4 = vld [vmem:[%s2042_s3] sm:$0xf] (!%p246_p3) }
   0x7   : > { %249 = sbr.rel (%p246_p3) target bundleno = 341 (0x155), region = 40  ;;  %v1408_v1 = vld [vmem:[%s2041_s2 + $0x4] sm:$0xf] (!%p246_p3)  ;;  %1694 = vmatprep.subr.msk.bf16.mxu1 (!%p246_p3), %vm448_vm0, %v1441_v0  ;;  %v701_v2 = vsel (!%p246_p3), %vm448_vm0, %v1441_v0, 0  ;;  %v380_v5 = vld [vmem:[%s2041_s2] sm:$0xf] (!%p246_p3) }
   0x8   : > { %1692 = vmatprep.subr.msk.bf16.mxu0 (!%p246_p3), %vm448_vm0, %v1408_v1  ;;  %v450_v3 = vsel (!%p246_p3), %vm448_vm0, %v1408_v1, 0  ;;  %1581 = vmatpush3.bf16.msra.mxu1 (!%p246_p3), %v701_v2  ;;  %vm423_vm1 = vcmask (!%p246_p3), 64512   ;;  %v801_v7 = vsel (!%p246_p3), %vm448_vm0, %v697_v4, 0  ;;  %v606_v9 = vsel (!%p246_p3), %vm448_vm0, %v380_v5, 0  ;;  %v1461_v18 = vld [vmem:[%s2042_s3 + $0x8] sm:$0xf] (!%p246_p3) }
   0x9   : > { %1545 = vmatpush3.bf16.msra.mxu0 (!%p246_p3), %v450_v3  ;;  %1695 = vmatprep.subr.msk.bf16.mxu1 (!%p246_p3), %vm448_vm0, %v697_v4  ;;  %v1768_v11 = vmov (!%p246_p3), 0.0   ;;  %v1458_v19 = vld [vmem:[%s2041_s2 + $0x8] sm:$0xf] (!%p246_p3)  ;;  %v956_v21 = vsel (!%p246_p3), %vm448_vm0, %v1461_v18, 0  ;;  %vm1769_vm2 = vmmov (!%p246_p3), 0   ;;  %vm1218_vm3 = vcmask (!%p246_p3), 1046528  }
   0xa   : > { %1693 = vmatprep.subr.msk.bf16.mxu0 (!%p246_p3), %vm448_vm0, %v380_v5  ;;  %v911_v22 = vsel (!%p246_p3), %vm448_vm0, %v1458_v19, 0  ;;  %vm1267_vm4 = vcmask (!%p246_p3), 31744  }
   0xe   : > { %s2050_s18 = smov (!%p306_p4, %s1758_s18), 1 }
   0xf   : > { %s1698_s30 = smul.u32 144, %s2050_s18  ;;  %s1485_s23 = sshll.u32 %s2050_s18, 6 }
  0x10   : > { %s1979_s28 = scalar_lea.vmem %s2044_s5, %s1485_s23 }
  0x11   : > { %s1842_s8 = scalar_lea.vmem %s2039_s0, %s1698_s30  ;;  %s1861_s9 = sadd.s32 128, %s1698_s30 }
  0x12   : > { %v1727_v6 = vld [vmem:[%s1842_s8 + $0x8] sm:$0xff]   ;;  %v1728_v8 = vld [vmem:[%s1842_s8 + $0x18] sm:$0xff]   ;;  %s332_s12 = scalar_lea.vmem %s2040_s1, %s1861_s9  ;;  %v1735_v17 = vld [vmem:[%s1842_s8] sm:$0xff]  }
  0x13   : > { %1546 = vmatprep.mubr.msk.bf16.mxu0 %vm423_vm1, %v1727_v6  ;;  %1582 = vmatprep.mubr.msk.bf16.mxu1 %vm423_vm1, %v1727_v6  ;;  %v1729_v10 = vld [vmem:[%s1842_s8 + $0x28] sm:$0xff]   ;;  %v1730_v12 = vld [vmem:[%s1842_s8 + $0x38] sm:$0xff]   ;;  %v1736_v20 = vld [vmem:[%s1842_s8 + $0x10] sm:$0xff]  }
  0x14   : > { %1547 = vmatmul.mubr.msk.bf16.vlgmr.msra.gmra.mrb[0].mxu0 %vm423_vm1, %v1728_v8  ;;  %1583 = vmatmul.mubr.msk.bf16.vlgmr.msra.gmra.mrb[0].mxu1 %vm423_vm1, %v1728_v8  ;;  %v1731_v13 = vld [vmem:[%s1842_s8 + $0x48] sm:$0xff]   ;;  %v1732_v14 = vld [vmem:[%s1842_s8 + $0x58] sm:$0xff]   ;;  %v1737_v23 = vld [vmem:[%s1842_s8 + $0x20] sm:$0xff]  }
  0x15   : > { %1599 = vmatpush3.bf16.msra.mxu1 %v801_v7  ;;  %1563 = vmatpush3.bf16.msra.mxu0 %v606_v9  ;;  %v1733_v15 = vld [vmem:[%s1842_s8 + $0x68] sm:$0xff]   ;;  %v1734_v16 = vld [vmem:[%s1842_s8 + $0x78] sm:$0xff]   ;;  %v1738_v24 = vld [vmem:[%s1842_s8 + $0x30] sm:$0xff]  }
  0x16   : > { %1550 = vmatprep.mubr.msk.bf16.mxu0 %vm423_vm1, %v1729_v10  ;;  %1586 = vmatprep.mubr.msk.bf16.mxu1 %vm423_vm1, %v1729_v10  ;;  %v1739_v25 = vld [vmem:[%s1842_s8 + $0x40] sm:$0xff]   ;;  %v1740_v26 = vld [vmem:[%s1842_s8 + $0x50] sm:$0xff]  }
  0x17   : > { %1622 = vmatprep.subr.bf16.mxu1 %v1768_v11  ;;  %1616 = vmatprep.subr.bf16.mxu0 %v1768_v11  ;;  %v1741_v27 = vld [vmem:[%s1842_s8 + $0x60] sm:$0xff]   ;;  %v1742_v28 = vld [vmem:[%s1842_s8 + $0x70] sm:$0xff]  }
  0x18   : > { %v1743_v29 = vld [vmem:[%s332_s12] sm:$0xff]  }
  0x1c   : > { %1551 = vmatmul.mubr.msk.bf16.gmra.mrb[4].mxu0 %vm423_vm1, %v1730_v12  ;;  %1587 = vmatmul.mubr.msk.bf16.gmra.mrb[4].mxu1 %vm423_vm1, %v1730_v12 }
  0x1d   : > { %1554 = vmatprep.mubr.msk.bf16.mxu0 %vm423_vm1, %v1731_v13  ;;  %1590 = vmatprep.mubr.msk.bf16.mxu1 %vm423_vm1, %v1731_v13 }
  0x24   : > { %1555 = vmatmul.mubr.msk.bf16.gmra.mrb[8].mxu0 %vm423_vm1, %v1732_v14  ;;  %1591 = vmatmul.mubr.msk.bf16.gmra.mrb[8].mxu1 %vm423_vm1, %v1732_v14 }
  0x25   : > { %1558 = vmatprep.mubr.msk.bf16.mxu0 %vm423_vm1, %v1733_v15  ;;  %1594 = vmatprep.mubr.msk.bf16.mxu1 %vm423_vm1, %v1733_v15 }
  0x2c   : > { %1559 = vmatmul.mubr.msk.bf16.gmra.mrb[12].mxu0 %vm423_vm1, %v1734_v16  ;;  %1595 = vmatmul.mubr.msk.bf16.gmra.mrb[12].mxu1 %vm423_vm1, %v1734_v16 }
  0x2d   : > { %1564 = vmatprep.mubr.msk.bf16.mxu0 %vm423_vm1, %v1735_v17  ;;  %1600 = vmatprep.mubr.msk.bf16.mxu1 %vm423_vm1, %v1735_v17 }
  0x34   : > { %1565 = vmatmul.mubr.msk.bf16.vlgmr.msra.gmra.mrb[0].mxu0 %vm423_vm1, %v1736_v20  ;;  %1601 = vmatmul.mubr.msk.bf16.vlgmr.msra.gmra.mrb[0].mxu1 %vm423_vm1, %v1736_v20 }
  0x35   : > { %1623 = vmatpush3.bf16.msra.mxu1 %v956_v21  ;;  %1617 = vmatpush3.bf16.msra.mxu0 %v911_v22 }
  0x36   : > { %1568 = vmatprep.mubr.msk.bf16.mxu0 %vm423_vm1, %v1737_v23  ;;  %1604 = vmatprep.mubr.msk.bf16.mxu1 %vm423_vm1, %v1737_v23 }
  0x37   : > { %1697 = vmatprep.subr.msk.bf16.mxu1 %vm448_vm0, %v1461_v18  ;;  %1696 = vmatprep.subr.msk.bf16.mxu0 %vm448_vm0, %v1458_v19 }
  0x3c   : > { %1569 = vmatmul.mubr.msk.bf16.gmra.mrb[4].mxu0 %vm423_vm1, %v1738_v24  ;;  %1605 = vmatmul.mubr.msk.bf16.gmra.mrb[4].mxu1 %vm423_vm1, %v1738_v24 }
  0x3d   : > { %1572 = vmatprep.mubr.msk.bf16.mxu0 %vm423_vm1, %v1739_v25  ;;  %1608 = vmatprep.mubr.msk.bf16.mxu1 %vm423_vm1, %v1739_v25 }
  0x44   : > { %1573 = vmatmul.mubr.msk.bf16.gmra.mrb[8].mxu0 %vm423_vm1, %v1740_v26  ;;  %1609 = vmatmul.mubr.msk.bf16.gmra.mrb[8].mxu1 %vm423_vm1, %v1740_v26 }
  0x45   : > { %1576 = vmatprep.mubr.msk.bf16.mxu0 %vm423_vm1, %v1741_v27  ;;  %1612 = vmatprep.mubr.msk.bf16.mxu1 %vm423_vm1, %v1741_v27 }
  0x4c   : > { %1577 = vmatmul.mubr.msk.bf16.gmra.mrb[16].mxu0 %vm423_vm1, %v1742_v28  ;;  %1613 = vmatmul.mubr.msk.bf16.gmra.mrb[12].mxu1 %vm423_vm1, %v1742_v28 }
  0x4d   : > { %1618 = vmatprep.mubr.msk.bf16.mxu0 %vm1769_vm2, %v1768_v11  ;;  %1624 = vmatprep.mubr.msk.bf16.mxu1 %vm1769_vm2, %v1768_v11 }
  0x54   : > { %1619 = vmatmul.mubr.msk.bf16.vlgmr.msra.gmra.mrb[20].mxu0 %vm423_vm1, %v1743_v29  ;;  %1625 = vmatmul.mubr.msk.bf16.vlgmr.msra.gmra.mrb[16].mxu1 %vm423_vm1, %v1743_v29 }
  0x55   : > { %1647 = vmatpush3.bf16.msra.mxu1 %v956_v21  ;;  %1629 = vmatpush3.bf16.msra.mxu0 %v911_v22 }
  0x56   : > { %1630 = vmatprep.mubr.msk.bf16.mxu0 %vm423_vm1, %v1735_v17  ;;  %1648 = vmatprep.mubr.msk.bf16.mxu1 %vm423_vm1, %v1735_v17  ;;  %v1973_v17 = vld [vmem:[%s2043_s4] ss:$0 sm:$0xff] }
  0x5c   : > { %1631 = vmatmul.mubr.msk.bf16.vlgmr.msra.gmra.mrb[24].mxu0 %vm423_vm1, %v1736_v20  ;;  %1649 = vmatmul.mubr.msk.bf16.vlgmr.msra.gmra.mrb[20].mxu1 %vm423_vm1, %v1736_v20 }
  0x5d   : > { %1634 = vmatprep.mubr.msk.bf16.mxu0 %vm423_vm1, %v1737_v23  ;;  %1652 = vmatprep.mubr.msk.bf16.mxu1 %vm423_vm1, %v1737_v23 }
  0x64   : > { %1635 = vmatmul.mubr.msk.bf16.gmra.mrb[28].mxu0 %vm423_vm1, %v1738_v24  ;;  %1653 = vmatmul.mubr.msk.bf16.gmra.mrb[24].mxu1 %vm423_vm1, %v1738_v24 }
  0x65   : > { %1638 = vmatprep.mubr.msk.bf16.mxu0 %vm423_vm1, %v1739_v25  ;;  %1656 = vmatprep.mubr.msk.bf16.mxu1 %vm423_vm1, %v1739_v25 }
  0x6c   : > { %1639 = vmatmul.mubr.msk.bf16.gmra.mrb[32].mxu0 %vm423_vm1, %v1740_v26  ;;  %1657 = vmatmul.mubr.msk.bf16.gmra.mrb[28].mxu1 %vm423_vm1, %v1740_v26 }
  0x6d   : > { %1642 = vmatprep.mubr.msk.bf16.mxu0 %vm423_vm1, %v1741_v27  ;;  %1660 = vmatprep.mubr.msk.bf16.mxu1 %vm423_vm1, %v1741_v27 }
  0x74   : > { %1643 = vmatmul.mubr.msk.bf16.gmra.mrb[36].mxu0 %vm423_vm1, %v1742_v28  ;;  %1661 = vmatmul.mubr.msk.bf16.gmra.mrb[32].mxu1 %vm423_vm1, %v1742_v28 }
  0xff   : > { %v1560_v30 = vpop.f32.mrb[12].mxu0 }
 0x100   : > { %v528_v31 = vpop.f32.mrb[13].mxu0 }
 0x101   : > { %v1561_v32 = vpop.f32.mrb[14].mxu0 }
 0x102   : > { %v531_v33 = vpop.f32.mrb[15].mxu0 }
 0x107   : > { %v1933_v34 = vpop.f32.mrb[0].mxu0  ;;  %v1935_v35 = vpop.f32.mrb[0].mxu1 }
 0x108   : > { %v642_v36 = vpop.f32.mrb[1].mxu0  ;;  %v837_v37 = vpop.f32.mrb[1].mxu1 }
 0x109   : > { %v1567_v38 = vpop.f32.mrb[2].mxu0  ;;  %v1937_v39 = vpop.f32.mrb[2].mxu1 }
 0x10a   : > { %v645_v40 = vpop.f32.mrb[3].mxu0  ;;  %v840_v41 = vpop.f32.mrb[3].mxu1 }
 0x10f   : > { %v1939_v42 = vpop.f32.mrb[4].mxu0  ;;  %v1941_v43 = vpop.f32.mrb[4].mxu1 }
 0x110   : > { %v1943_v44 = vpop.f32.mrb[5].mxu0  ;;  %v1945_v45 = vpop.f32.mrb[5].mxu1 }
 0x111   : > { %v1571_v46 = vpop.f32.mrb[6].mxu0  ;;  %v1947_v47 = vpop.f32.mrb[6].mxu1 }
 0x112   : > { %v659_v48 = vpop.f32.mrb[7].mxu0  ;;  %v1949_v49 = vpop.f32.mrb[7].mxu1 }
 0x117   : > { %v1951_v50 = vpop.f32.mrb[8].mxu0  ;;  %v1953_v51 = vpop.f32.mrb[8].mxu1 }
 0x118   : > { %v1955_v52 = vpop.f32.mrb[9].mxu0  ;;  %v1957_v53 = vpop.f32.mrb[9].mxu1 }
 0x119   : > { %v1575_v54 = vpop.f32.mrb[10].mxu0  ;;  %v1959_v55 = vpop.f32.mrb[10].mxu1 }
 0x11a   : > { %v673_v56 = vpop.f32.mrb[11].mxu0  ;;  %v1961_v57 = vpop.f32.mrb[11].mxu1 }
 0x11f   : > { %v1578_v58 = vpop.f32.mrb[16].mxu0  ;;  %v1614_v59 = vpop.f32.mrb[12].mxu1 }
 0x120   : > { %v692_v60 = vadd.f32 %v1578_v58, %v1560_v30  ;;  %v684_v61 = vpop.f32.mrb[17].mxu0  ;;  %v1963_v62 = vpop.f32.mrb[13].mxu1 }
 0x121   : > { %v1965_v63 = vadd.f32 %v684_v61, %v528_v31  ;;  %v1615_v0 = vpop.f32.mrb[14].mxu1  ;;  %v1579_v1 = vpop.f32.mrb[18].mxu0 }
 0x122   : > { %v1967_v2 = vpop.f32.mrb[15].mxu1  ;;  %v687_v3 = vpop.f32.mrb[19].mxu0 }
 0x127   : > { %v947_v4 = vpop.f32.mrb[20].mxu0  ;;  %v992_v5 = vpop.f32.mrb[16].mxu1 }
 0x128   : > { %v1275_v6 = vadd.f32 %v947_v4, %v692_v60  ;;  %v1276_v7 = vadd.f32 %v1614_v59, %v992_v5  ;;  %v1626_v8 = vpop.f32.mrb[17].mxu1  ;;  %v1620_v9 = vpop.f32.mrb[21].mxu0 }
 0x129   : > { %v995_v10 = vpop.f32.mrb[18].mxu1  ;;  %v950_v11 = vpop.f32.mrb[22].mxu0 }
 0x12a   : > { %v1277_v12 = vadd.f32 %v1615_v0, %v995_v10  ;;  %v1627_v13 = vpop.f32.mrb[19].mxu1  ;;  %v1621_v14 = vpop.f32.mrb[23].mxu0  ;;  %v1280_v15 = vrot.slane %v1276_v7, 1 }
 0x12c   : > { %v1281_v16 = vrot.slane %v1277_v12, 1 }
 0x12e   : > { %v1282_v18 = vsel %vm1218_vm3, %v1280_v15, %v1281_v16 }
 0x12f   : > { %v1284_v19 = vadd.f32 %v1282_v18, %v1275_v6  ;;  %v1632_v20 = vpop.f32.mrb[24].mxu0  ;;  %v1650_v21 = vpop.f32.mrb[20].mxu1 }
 0x130   : > { %v1183_v22 = vadd.f32 %v1632_v20, %v642_v36  ;;  %v1190_v23 = vadd.f32 %v1650_v21, %v837_v37  ;;  %v1122_v24 = vpop.f32.mrb[21].mxu1  ;;  %v1034_v25 = vpop.f32.mrb[25].mxu0 }
 0x131   : > { %v1285_v26 = vadd.f32 %v1973_v17, %v1284_v19  ;;  %v1651_v27 = vpop.f32.mrb[22].mxu1  ;;  %v1633_v28 = vpop.f32.mrb[26].mxu0 }
 0x132   : > { %v1191_v29 = vadd.f32 %v1651_v27, %v840_v41  ;;  %v1124_v30 = vpop.f32.mrb[23].mxu1  ;;  %v1036_v31 = vpop.f32.mrb[27].mxu0  ;;  %v1219_v32 = vrot.slane %v1190_v23, 1 }
 0x133   : > { %1480 = vst.msk [vmem:[%s1979_s28 + $0x38] sm:$0xff] %vm1267_vm4, %v1285_v26 }
 0x134   : > { %v1220_v33 = vrot.slane %v1191_v29, 1 }
 0x136   : > { %v1221_v38 = vsel %vm1218_vm3, %v1219_v32, %v1220_v33 }
 0x137   : > { %v1247_v40 = vadd.f32 %v1221_v38, %v1183_v22  ;;  %v1636_v46 = vpop.f32.mrb[28].mxu0  ;;  %v1654_v36 = vpop.f32.mrb[24].mxu1 }
 0x138   : > { %v1185_v37 = vadd.f32 %v1636_v46, %v1943_v44  ;;  %v1194_v48 = vadd.f32 %v1654_v36, %v1945_v45  ;;  %v1047_v54 = vpop.f32.mrb[29].mxu0  ;;  %v1136_v56 = vpop.f32.mrb[25].mxu1 }
 0x139   : > { %v1260_v41 = vadd.f32 %v1973_v17, %v1247_v40  ;;  %v1184_v58 = vadd.f32 %v1933_v34, %v1047_v54  ;;  %v1192_v59 = vadd.f32 %v1935_v35, %v1136_v56  ;;  %v1655_v60 = vpop.f32.mrb[26].mxu1  ;;  %v1637_v61 = vpop.f32.mrb[30].mxu0 }
 0x13a   : > { %v1195_v0 = vadd.f32 %v1655_v60, %v1949_v49  ;;  %v1139_v1 = vpop.f32.mrb[27].mxu1  ;;  %v1050_v3 = vpop.f32.mrb[31].mxu0  ;;  %v1225_v4 = vrot.slane %v1194_v48, 1 }
 0x13b   : > { %1268 = vst.msk [vmem:[%s1979_s28] sm:$0xff] %vm1267_vm4, %v1260_v41  ;;  %v1193_v44 = vadd.f32 %v1937_v39, %v1139_v1  ;;  %v1222_v5 = vrot.slane %v1192_v59, 1 }
 0x13c   : > { %v1226_v45 = vrot.slane %v1195_v0, 1 }
 0x13d   : > { %v1223_v6 = vrot.slane %v1193_v44, 1 }
 0x13e   : > { %v1227_v7 = vsel %vm1218_vm3, %v1225_v4, %v1226_v45 }
 0x13f   : > { %v1249_v8 = vadd.f32 %v1227_v7, %v1185_v37  ;;  %v1224_v34 = vsel %vm1218_vm3, %v1222_v5, %v1223_v6  ;;  %v1640_v35 = vpop.f32.mrb[32].mxu0  ;;  %v1658_v9 = vpop.f32.mrb[28].mxu1 }
 0x140   : > { %v1248_v10 = vadd.f32 %v1224_v34, %v1184_v58  ;;  %v1187_v49 = vadd.f32 %v1640_v35, %v1955_v52  ;;  %v1198_v11 = vadd.f32 %v1658_v9, %v1957_v53  ;;  %v1061_v12 = vpop.f32.mrb[33].mxu0  ;;  %v1152_v39 = vpop.f32.mrb[29].mxu1 }
 0x141   : > { %v1262_v13 = vadd.f32 %v1973_v17, %v1249_v8  ;;  %v1186_v14 = vadd.f32 %v1939_v42, %v1061_v12  ;;  %v1196_v15 = vadd.f32 %v1941_v43, %v1152_v39  ;;  %v1659_v16 = vpop.f32.mrb[30].mxu1  ;;  %v1641_v18 = vpop.f32.mrb[34].mxu0 }
 0x142   : > { %v1261_v19 = vadd.f32 %v1973_v17, %v1248_v10  ;;  %v1199_v20 = vadd.f32 %v1659_v16, %v1961_v57  ;;  %v1155_v21 = vpop.f32.mrb[31].mxu1  ;;  %v1064_v22 = vpop.f32.mrb[35].mxu0  ;;  %v1231_v53 = vrot.slane %v1198_v11, 1 }
 0x143   : > { %1270 = vst.msk [vmem:[%s1979_s28 + $0x10] sm:$0xff] %vm1267_vm4, %v1262_v13  ;;  %v1197_v52 = vadd.f32 %v1947_v47, %v1155_v21  ;;  %v1228_v24 = vrot.slane %v1196_v15, 1 }
 0x144   : > { %1269 = vst.msk [vmem:[%s1979_s28 + $0x8] sm:$0xff] %vm1267_vm4, %v1261_v19  ;;  %v1232_v23 = vrot.slane %v1199_v20, 1 }
 0x145   : > { %v1229_v42 = vrot.slane %v1197_v52, 1 }
 0x146   : > { %v1233_v43 = vsel %vm1218_vm3, %v1231_v53, %v1232_v23 }
 0x147   : > { %v1251_v25 = vadd.f32 %v1233_v43, %v1187_v49  ;;  %v1230_v26 = vsel %vm1218_vm3, %v1228_v24, %v1229_v42  ;;  %v1644_v27 = vpop.f32.mrb[36].mxu0  ;;  %v1662_v57 = vpop.f32.mrb[32].mxu1 }
 0x148   : > { %v1250_v28 = vadd.f32 %v1230_v26, %v1186_v14  ;;  %v1189_v29 = vadd.f32 %v1644_v27, %v1965_v63  ;;  %v1202_v47 = vadd.f32 %v1662_v57, %v1963_v62  ;;  %v1075_v30 = vpop.f32.mrb[37].mxu0  ;;  %v1168_v31 = vpop.f32.mrb[33].mxu1 }
 0x149   : > { %v1264_v32 = vadd.f32 %v1973_v17, %v1251_v25  ;;  %v1188_v33 = vadd.f32 %v1951_v50, %v1075_v30  ;;  %v1200_v38 = vadd.f32 %v1953_v51, %v1168_v31  ;;  %v1663_v40 = vpop.f32.mrb[34].mxu1  ;;  %v1645_v46 = vpop.f32.mrb[38].mxu0 }
 0x14a   : > { %v1263_v36 = vadd.f32 %v1973_v17, %v1250_v28  ;;  %v1203_v37 = vadd.f32 %v1663_v40, %v1967_v2  ;;  %v1171_v48 = vpop.f32.mrb[35].mxu1  ;;  %v1078_v63 = vpop.f32.mrb[39].mxu0  ;;  %v1237_v54 = vrot.slane %v1202_v47, 1 }
 0x14b   : > { %1272 = vst.msk [vmem:[%s1979_s28 + $0x20] sm:$0xff] %vm1267_vm4, %v1264_v32  ;;  %v1201_v62 = vadd.f32 %v1959_v55, %v1171_v48  ;;  %v1234_v56 = vrot.slane %v1200_v38, 1 }
 0x14c   : > { %1271 = vst.msk [vmem:[%s1979_s28 + $0x18] sm:$0xff] %vm1267_vm4, %v1263_v36  ;;  %v1238_v50 = vrot.slane %v1203_v37, 1 }
 0x14d   : > { %v1235_v51 = vrot.slane %v1201_v62, 1 }
 0x14e   : > { %v1239_v41 = vsel %vm1218_vm3, %v1237_v54, %v1238_v50 }
 0x14f   : > { %v1253_v58 = vadd.f32 %v1239_v41, %v1189_v29  ;;  %v1236_v59 = vsel %vm1218_vm3, %v1234_v56, %v1235_v51 }
 0x150   : > { %v1252_v2 = vadd.f32 %v1236_v59, %v1188_v33 }
 0x151   : > { %v1266_v60 = vadd.f32 %v1973_v17, %v1253_v58 }
 0x152   : > { %v1265_v61 = vadd.f32 %v1973_v17, %v1252_v2 }
 0x153   : > { %1274 = vst.msk [vmem:[%s1979_s28 + $0x30] sm:$0xff] %vm1267_vm4, %v1266_v60 }
 0x154   : > { %1273 = vst.msk [vmem:[%s1979_s28 + $0x28] sm:$0xff] %vm1267_vm4, %v1265_v61 }
 0x155 PF: > { %s15_s20 = sadd.s32 1, %s1766_s20   ;;  %s2045_s18 = smov %s1762_s19 }
 0x156   : > { %p12_p5 = scmp.ge.s32.totalorder %s15_s20, 4   ;;  %s2046_s19 = smov %s2048_s21 }
 0x158   :  { %14 = sbr.rel (!%p12_p5) target bundleno = 2 (0x2), region = 78 }

</bundles_post_ra>
